<compile_context>
chip_gen: v7x
topology: tpu7x:2x2x1
jax: 0.10.0
libtpu: 0.0.40
codegen_flags: <defaults>
</compile_context>

<pallas_src>
import functools

import jax
import jax.numpy as jnp
from jax.experimental import pallas as pl
from jax.experimental.pallas import tpu as pltpu


# ----------------------------- Pallas kernel -------------------------------- #
def cnn_kernel(ids_ref, emb_ref, wstack_ref, bconv_ref, wl_ref, bl_ref, out_ref,
               *, kernel_heights, out_channels):
    """One batch tile per grid step.

    ids_ref    : (Bt, S)   int32 token ids
    emb_ref    : (V, E)    embedding table (resident, constant index_map)
    wstack_ref : (E, sum(kh)*C)  all conv taps stacked along N
    bconv_ref  : (1, 3*C)  concatenated conv biases
    wl_ref     : (3*C, O)  final linear weight (transposed)
    bl_ref     : (1, O)    final linear bias
    out_ref    : (Bt, O)   sigmoid(logits) for this batch tile
    """
    Bt, S = ids_ref.shape
    V, E = emb_ref.shape
    TOT = wstack_ref.shape[1]
    C = out_channels

    # --- fused embedding lookup: one-hot(ids) @ emb_table on the MXU --------
    ids = ids_ref[...]                                               # (Bt, S)
    iota_v = jax.lax.broadcasted_iota(jnp.int32, (Bt, S, V), 2)
    onehot = (ids[:, :, None] == iota_v).astype(jnp.float32)         # (Bt, S, V)
    onehot = onehot.reshape(Bt * S, V)
    x = jnp.dot(onehot, emb_ref[...],
                preferred_element_type=jnp.float32)                  # (Bt*S, E)

    # --- all taps of all three convs as ONE matmul (N = sum(kh)*C) ----------
    p = jnp.dot(x, wstack_ref[...],
                preferred_element_type=jnp.float32)                  # (Bt*S, TOT)
    p = p.reshape(Bt, S, TOT)

    # --- shift-and-add taps -> max over time; bias+ReLU hoisted past max ----
    feats = []
    tap = 0
    for kh in kernel_heights:
        s_out = S - kh + 1
        h = p[:, 0:s_out, tap * C:(tap + 1) * C]
        for dh in range(1, kh):
            h = h + p[:, dh:dh + s_out, (tap + dh) * C:(tap + dh + 1) * C]
        feats.append(jnp.max(h, axis=1))                             # (Bt, C)
        tap += kh
    feat = jnp.concatenate(feats, axis=1)                            # (Bt, 3C)
    # max_t relu(h_t + b) == relu(max_t h_t + b): bias const per channel, ReLU monotone.
    feat = jnp.maximum(feat + bconv_ref[...], 0.0)

    # TODO(synk): nn.Dropout is inference-time identity here (no RNG mask applied).
    logits = jnp.dot(feat, wl_ref[...],
                     preferred_element_type=jnp.float32) + bl_ref[...]
    out_ref[...] = jax.nn.sigmoid(logits)                            # (Bt, O)


# ------------------------------ wrapper -------------------------------------- #
def cnn_forward(token_ids, params, kernel_heights, *, b_tile=None):
    """token_ids: int [B, S].  Returns float32 [B, output_size]."""
    emb = params["emb"]                                   # [V, E]
    V, E = emb.shape
    B, S = token_ids.shape
    C = params["conv1_w"].shape[0]
    O = params["label_w"].shape[0]
    n_convs = len(kernel_heights)

    # Batch tiling: single grid step for small batches; otherwise 8-row tiles
    # (keeps the sublane dim of the block a multiple of 8 and leaves >=2 grid
    # steps for the two v7x TensorCores at realistic batch sizes).
    if b_tile is None:
        b_tile = B if B <= 8 else 8
    B_pad = -(-B // b_tile) * b_tile
    ids = token_ids.astype(jnp.int32)
    if B_pad != B:
        ids = jnp.pad(ids, ((0, B_pad - B), (0, 0)))      # pad rows use token 0
    n_tiles = B_pad // b_tile

    # Stack all conv taps along N: column block (tap_off_i + dh) holds
    # W_i[:, 0, dh, :].T  (E, C); dh-major tap order per conv.
    taps = []
    for i, kh in enumerate(kernel_heights):
        w = params[f"conv{i + 1}_w"]                      # (C, 1, kh, E)
        for dh in range(kh):
            taps.append(w[:, 0, dh, :].T)                 # (E, C)
    w_stack = jnp.concatenate(taps, axis=1)               # (E, sum(kh)*C)
    b_conv = jnp.concatenate(
        [params[f"conv{i + 1}_b"] for i in range(n_convs)]).reshape(1, n_convs * C)
    wl = params["label_w"].T                              # (3C, O)
    bl = params["label_b"].reshape(1, O)                  # (1, O)

    # Weights/table are tiny and constant across the grid -> constant index maps.
    full = lambda arr: pl.BlockSpec(arr.shape, lambda b: (0,) * arr.ndim)

    kernel = functools.partial(cnn_kernel,
                               kernel_heights=tuple(kernel_heights),
                               out_channels=C)

    out = pl.pallas_call(
        kernel,
        out_shape=jax.ShapeDtypeStruct((B_pad, O), jnp.float32),
        grid_spec=pltpu.PrefetchScalarGridSpec(
            num_scalar_prefetch=0,
            grid=(n_tiles,),
            in_specs=[
                pl.BlockSpec((b_tile, S), lambda b: (b, 0)),   # token ids (batch tile)
                full(emb), full(w_stack), full(b_conv), full(wl), full(bl),
            ],
            out_specs=pl.BlockSpec((b_tile, O), lambda b: (b, 0)),
        ),
        compiler_params=pltpu.CompilerParams(
            dimension_semantics=("parallel",)),
    )(ids, emb, w_stack, b_conv, wl, bl)

    return out[:B]


# ------------------------------ main ----------------------------------------- #
if __name__ == "__main__":
    batch_size = 2
    output_size = 4
    in_channels = 1
    out_channels = 8
    kernel_heights = (3, 4, 5)
    vocab_size = 50
    embedding_length = 32
    seq_len = 16

    key = jax.random.PRNGKey(0)
    keys = jax.random.split(key, 10)

    params = {
        "emb": jax.random.normal(keys[0], (vocab_size, embedding_length),
                                 dtype=jnp.float32) * 0.1,
        "conv1_w": jax.random.normal(
            keys[1], (out_channels, in_channels, kernel_heights[0],
                      embedding_length), dtype=jnp.float32) * 0.1,
        "conv1_b": jax.random.normal(keys[2], (out_channels,),
                                     dtype=jnp.float32) * 0.1,
        "conv2_w": jax.random.normal(
            keys[3], (out_channels, in_channels, kernel_heights[1],
                      embedding_length), dtype=jnp.float32) * 0.1,
        "conv2_b": jax.random.normal(keys[4], (out_channels,),
                                     dtype=jnp.float32) * 0.1,
        "conv3_w": jax.random.normal(
            keys[5], (out_channels, in_channels, kernel_heights[2],
                      embedding_length), dtype=jnp.float32) * 0.1,
        "conv3_b": jax.random.normal(keys[6], (out_channels,),
                                     dtype=jnp.float32) * 0.1,
        "label_w": jax.random.normal(
            keys[7], (output_size, len(kernel_heights) * out_channels),
            dtype=jnp.float32) * 0.1,
        "label_b": jax.random.normal(keys[8], (output_size,),
                                     dtype=jnp.float32) * 0.1,
    }

    token_ids = jax.random.randint(keys[9], (batch_size, seq_len),
                                   minval=0, maxval=vocab_size,
                                   dtype=jnp.int32)

    out = cnn_forward(token_ids, params, kernel_heights)
    jax.block_until_ready(out)

    # Pure-JAX reference (same math as the PyTorch module in eval mode).
    x_emb = jnp.take(params["emb"], token_ids, axis=0)                 # [B, S, E]
    feats = []
    for i, kh in enumerate(kernel_heights):
        w = params[f"conv{i + 1}_w"].reshape(out_channels, kh * embedding_length)
        s_out = seq_len - kh + 1
        win = jnp.concatenate(
            [x_emb[:, dh:dh + s_out, :] for dh in range(kh)], axis=2)  # [B,s_out,kh*E]
        h = jnp.einsum("bsk,ck->bsc", win, w) + params[f"conv{i + 1}_b"]
        feats.append(jnp.max(jax.nn.relu(h), axis=1))
    feat_ref = jnp.concatenate(feats, axis=1)
    ref = jax.nn.sigmoid(feat_ref @ params["label_w"].T + params["label_b"])

    assert out.shape == (batch_size, output_size)
    assert bool(jnp.all(jnp.isfinite(out)))
    assert bool(jnp.allclose(out, ref, atol=1e-3, rtol=1e-3))
    print("KERNEL_OK")
</pallas_src>

<mosaic_0001>
module attributes {stable_mosaic.version = 11 : i64} {
  func.func @cnn_kernel(%arg0: i32, %arg1: memref<2x16xi32, #tpu.memory_space<vmem>>, %arg2: memref<50x32xf32, #tpu.memory_space<vmem>>, %arg3: memref<32x96xf32, #tpu.memory_space<vmem>>, %arg4: memref<1x24xf32, #tpu.memory_space<vmem>>, %arg5: memref<24x4xf32, #tpu.memory_space<vmem>>, %arg6: memref<1x4xf32, #tpu.memory_space<vmem>>, %arg7: memref<2x4xf32, #tpu.memory_space<vmem>>) attributes {dimension_semantics = [#tpu.dimension_semantics<parallel>], iteration_bounds = array<i64: 1>, scalar_prefetch = 0 : i64, scratch_operands = 0 : i64, tpu.core_type = #tpu.core_type<tc>, window_params = [{transform_indices = @transform_0, window_bounds = array<i64: 2, 16>}, {pipeline_mode = #tpu.pipeline_mode<synchronous>, transform_indices = @transform_1, window_bounds = array<i64: 50, 32>}, {pipeline_mode = #tpu.pipeline_mode<synchronous>, transform_indices = @transform_2, window_bounds = array<i64: 32, 96>}, {pipeline_mode = #tpu.pipeline_mode<synchronous>, transform_indices = @transform_3, window_bounds = array<i64: 1, 24>}, {pipeline_mode = #tpu.pipeline_mode<synchronous>, transform_indices = @transform_4, window_bounds = array<i64: 24, 4>}, {pipeline_mode = #tpu.pipeline_mode<synchronous>, transform_indices = @transform_5, window_bounds = array<i64: 1, 4>}, {transform_indices = @transform_6, window_bounds = array<i64: 2, 4>}]} {
    %c0 = arith.constant 0 : index
    %c0_0 = arith.constant 0 : index
    %0 = vector.load %arg1[%c0, %c0_0] : memref<2x16xi32, #tpu.memory_space<vmem>>, vector<2x16xi32>
    %1 = tpu.iota {dimensions = array<i32: 2>} : vector<2x16x50xi32>
    %2 = vector.shape_cast %0 : vector<2x16xi32> to vector<2x16x1xi32>
    %3 = vector.broadcast %2 : vector<2x16x1xi32> to vector<2x16x50xi32>
    %4 = arith.cmpi eq, %3, %1 : vector<2x16x50xi32>
    %5 = arith.extui %4 : vector<2x16x50xi1> to vector<2x16x50xi32>
    %6 = arith.sitofp %5 : vector<2x16x50xi32> to vector<2x16x50xf32>
    %7 = vector.shape_cast %6 : vector<2x16x50xf32> to vector<32x50xf32>
    %c0_1 = arith.constant 0 : index
    %c0_2 = arith.constant 0 : index
    %8 = vector.load %arg2[%c0_1, %c0_2] : memref<50x32xf32, #tpu.memory_space<vmem>>, vector<50x32xf32>
    %cst = arith.constant dense<0.000000e+00> : vector<32x32xf32>
    %9 = tpu.matmul %7, %8, %cst {dimension_numbers = #tpu.dot_dimension_numbers<[1], [0], [0], [1], [0, 0, 1, 1], [], []>} : vector<32x50xf32>, vector<50x32xf32>, vector<32x32xf32> -> vector<32x32xf32>
    %c0_3 = arith.constant 0 : index
    %c0_4 = arith.constant 0 : index
    %10 = vector.load %arg3[%c0_3, %c0_4] : memref<32x96xf32, #tpu.memory_space<vmem>>, vector<32x96xf32>
    %cst_5 = arith.constant dense<0.000000e+00> : vector<32x96xf32>
    %11 = tpu.matmul %9, %10, %cst_5 {dimension_numbers = #tpu.dot_dimension_numbers<[1], [0], [0], [1], [0, 0, 1, 1], [], []>} : vector<32x32xf32>, vector<32x96xf32>, vector<32x96xf32> -> vector<32x96xf32>
    %12 = vector.shape_cast %11 : vector<32x96xf32> to vector<2x16x96xf32>
    %13 = vector.extract_strided_slice %12 {offsets = [0, 0, 0], sizes = [2, 14, 8], strides = [1, 1, 1]} : vector<2x16x96xf32> to vector<2x14x8xf32>
    %14 = vector.extract_strided_slice %12 {offsets = [0, 1, 8], sizes = [2, 14, 8], strides = [1, 1, 1]} : vector<2x16x96xf32> to vector<2x14x8xf32>
    %15 = arith.addf %13, %14 : vector<2x14x8xf32>
    %16 = vector.extract_strided_slice %12 {offsets = [0, 2, 16], sizes = [2, 14, 8], strides = [1, 1, 1]} : vector<2x16x96xf32> to vector<2x14x8xf32>
    %17 = arith.addf %15, %16 : vector<2x14x8xf32>
    %cst_6 = arith.constant dense<0xFF800000> : vector<2x8xf32>
    %18 = vector.multi_reduction <maximumf>, %17, %cst_6 [1] : vector<2x14x8xf32> to vector<2x8xf32>
    %19 = vector.extract_strided_slice %12 {offsets = [0, 0, 24], sizes = [2, 13, 8], strides = [1, 1, 1]} : vector<2x16x96xf32> to vector<2x13x8xf32>
    %20 = vector.extract_strided_slice %12 {offsets = [0, 1, 32], sizes = [2, 13, 8], strides = [1, 1, 1]} : vector<2x16x96xf32> to vector<2x13x8xf32>
    %21 = arith.addf %19, %20 : vector<2x13x8xf32>
    %22 = vector.extract_strided_slice %12 {offsets = [0, 2, 40], sizes = [2, 13, 8], strides = [1, 1, 1]} : vector<2x16x96xf32> to vector<2x13x8xf32>
    %23 = arith.addf %21, %22 : vector<2x13x8xf32>
    %24 = vector.extract_strided_slice %12 {offsets = [0, 3, 48], sizes = [2, 13, 8], strides = [1, 1, 1]} : vector<2x16x96xf32> to vector<2x13x8xf32>
    %25 = arith.addf %23, %24 : vector<2x13x8xf32>
    %cst_7 = arith.constant dense<0xFF800000> : vector<2x8xf32>
    %26 = vector.multi_reduction <maximumf>, %25, %cst_7 [1] : vector<2x13x8xf32> to vector<2x8xf32>
    %27 = vector.extract_strided_slice %12 {offsets = [0, 0, 56], sizes = [2, 12, 8], strides = [1, 1, 1]} : vector<2x16x96xf32> to vector<2x12x8xf32>
    %28 = vector.extract_strided_slice %12 {offsets = [0, 1, 64], sizes = [2, 12, 8], strides = [1, 1, 1]} : vector<2x16x96xf32> to vector<2x12x8xf32>
    %29 = arith.addf %27, %28 : vector<2x12x8xf32>
    %30 = vector.extract_strided_slice %12 {offsets = [0, 2, 72], sizes = [2, 12, 8], strides = [1, 1, 1]} : vector<2x16x96xf32> to vector<2x12x8xf32>
    %31 = arith.addf %29, %30 : vector<2x12x8xf32>
    %32 = vector.extract_strided_slice %12 {offsets = [0, 3, 80], sizes = [2, 12, 8], strides = [1, 1, 1]} : vector<2x16x96xf32> to vector<2x12x8xf32>
    %33 = arith.addf %31, %32 : vector<2x12x8xf32>
    %34 = vector.extract_strided_slice %12 {offsets = [0, 4, 88], sizes = [2, 12, 8], strides = [1, 1, 1]} : vector<2x16x96xf32> to vector<2x12x8xf32>
    %35 = arith.addf %33, %34 : vector<2x12x8xf32>
    %cst_8 = arith.constant dense<0xFF800000> : vector<2x8xf32>
    %36 = vector.multi_reduction <maximumf>, %35, %cst_8 [1] : vector<2x12x8xf32> to vector<2x8xf32>
    %37 = tpu.concatenate %18, %26, %36 in 1 : vector<2x8xf32>, vector<2x8xf32>, vector<2x8xf32> -> vector<2x24xf32>
    %c0_9 = arith.constant 0 : index
    %c0_10 = arith.constant 0 : index
    %38 = vector.load %arg4[%c0_9, %c0_10] : memref<1x24xf32, #tpu.memory_space<vmem>>, vector<1x24xf32>
    %39 = vector.broadcast %38 : vector<1x24xf32> to vector<2x24xf32>
    %40 = arith.addf %37, %39 : vector<2x24xf32>
    %cst_11 = arith.constant 0.000000e+00 : f32
    %41 = vector.broadcast %cst_11 : f32 to vector<2x24xf32>
    %42 = arith.maximumf %40, %41 : vector<2x24xf32>
    %c0_12 = arith.constant 0 : index
    %c0_13 = arith.constant 0 : index
    %43 = vector.load %arg5[%c0_12, %c0_13] : memref<24x4xf32, #tpu.memory_space<vmem>>, vector<24x4xf32>
    %cst_14 = arith.constant dense<0.000000e+00> : vector<2x4xf32>
    %44 = tpu.matmul %42, %43, %cst_14 {dimension_numbers = #tpu.dot_dimension_numbers<[1], [0], [0], [1], [0, 0, 1, 1], [], []>} : vector<2x24xf32>, vector<24x4xf32>, vector<2x4xf32> -> vector<2x4xf32>
    %c0_15 = arith.constant 0 : index
    %c0_16 = arith.constant 0 : index
    %45 = vector.load %arg6[%c0_15, %c0_16] : memref<1x4xf32, #tpu.memory_space<vmem>>, vector<1x4xf32>
    %46 = vector.broadcast %45 : vector<1x4xf32> to vector<2x4xf32>
    %47 = arith.addf %44, %46 : vector<2x4xf32>
    %48 = arith.negf %47 : vector<2x4xf32>
    %49 = math.exp %48 : vector<2x4xf32>
    %cst_17 = arith.constant 1.000000e+00 : f32
    %50 = vector.broadcast %cst_17 : f32 to vector<2x4xf32>
    %51 = arith.addf %50, %49 : vector<2x4xf32>
    %52 = arith.divf %50, %51 : vector<2x4xf32>
    %c0_18 = arith.constant 0 : index
    %c0_19 = arith.constant 0 : index
    %53 = vector.load %arg7[%c0_18, %c0_19] : memref<2x4xf32, #tpu.memory_space<vmem>>, vector<2x4xf32>
    tpu.vector_store %arg7[%c0_18, %c0_19], %52 {strides = array<i32>} : memref<2x4xf32, #tpu.memory_space<vmem>>, vector<2x4xf32>,
    return
  }
  func.func @transform_0(%arg0: i32) -> (i32, i32) {
    %c0_i32 = arith.constant 0 : i32
    %c0_i32_0 = arith.constant 0 : i32
    return %arg0, %c0_i32 : i32, i32
  }
  func.func @transform_1(%arg0: i32) -> (i32, i32) {
    %c0_i32 = arith.constant 0 : i32
    %c0_i32_0 = arith.constant 0 : i32
    %c0_i32_1 = arith.constant 0 : i32
    return %c0_i32, %c0_i32_0 : i32, i32
  }
  func.func @transform_2(%arg0: i32) -> (i32, i32) {
    %c0_i32 = arith.constant 0 : i32
    %c0_i32_0 = arith.constant 0 : i32
    %c0_i32_1 = arith.constant 0 : i32
    return %c0_i32, %c0_i32_0 : i32, i32
  }
  func.func @transform_3(%arg0: i32) -> (i32, i32) {
    %c0_i32 = arith.constant 0 : i32
    %c0_i32_0 = arith.constant 0 : i32
    %c0_i32_1 = arith.constant 0 : i32
    return %c0_i32, %c0_i32_0 : i32, i32
  }
  func.func @transform_4(%arg0: i32) -> (i32, i32) {
    %c0_i32 = arith.constant 0 : i32
    %c0_i32_0 = arith.constant 0 : i32
    %c0_i32_1 = arith.constant 0 : i32
    return %c0_i32, %c0_i32_0 : i32, i32
  }
  func.func @transform_5(%arg0: i32) -> (i32, i32) {
    %c0_i32 = arith.constant 0 : i32
    %c0_i32_0 = arith.constant 0 : i32
    %c0_i32_1 = arith.constant 0 : i32
    return %c0_i32, %c0_i32_0 : i32, i32
  }
  func.func @transform_6(%arg0: i32) -> (i32, i32) {
    %c0_i32 = arith.constant 0 : i32
    %c0_i32_0 = arith.constant 0 : i32
    return %arg0, %c0_i32 : i32, i32
  }
}

</mosaic_0001>

<bundles_post_ra>
// kernel: tpu_custom_call.1
= control target key start
LH: loop header
LB: loop body
LE: loop exit
PB: predicated region body
PF: predicated region fallthrough
CT: control target
= control target key end

     0   :  { %v25_v0 = vlaneseq  ;;  %s870_s0 = inlined_call_operand.vmem [shape: s32[2,16], index: 0, kind: input, shape index: {}]   ;;  %s871_s1 = inlined_call_operand.vmem [shape: f32[50,32], index: 1, kind: input, shape index: {}]   ;;  %s872_s2 = inlined_call_operand.vmem [shape: f32[32,96], index: 2, kind: input, shape index: {}]   ;;  %s873_s3 = inlined_call_operand.vmem [shape: f32[1,24], index: 3, kind: input, shape index: {}]   ;;  %s874_s4 = inlined_call_operand.vmem [shape: f32[24,4], index: 4, kind: input, shape index: {}]   ;;  %s875_s5 = inlined_call_operand.vmem [shape: f32[1,4], index: 5, kind: input, shape index: {}]   ;;  %s876_s6 = inlined_call_operand.hbm [shape: f32[2,4], index: 6, kind: output, shape index: {}]  }
   0x1   :  { %v61_v1 = vld [vmem:[%s871_s1] sm:$0xff]  ;;  %v62_v2 = vld [vmem:[%s871_s1 + $0x8] sm:$0xff]  ;;  %v63_v4 = vld [vmem:[%s871_s1 + $0x10] sm:$0xff] }
   0x2   :  { %v646_v3 = vpack.c.bf16 %v62_v2, %v61_v1  ;;  %v64_v5 = vld [vmem:[%s871_s1 + $0x18] sm:$0xff]  ;;  %v24_v6 = vld [vmem:[%s870_s0] sm:$0x3]  ;;  %v28_v7 = vshrl.u32 %v25_v0, 7  ;;  %v66_v10 = vld [vmem:[%s871_s1 + $0x28] sm:$0xff] }
   0x3   :  { %v650_v8 = vpack.c.bf16 %v64_v5, %v63_v4  ;;  %v65_v9 = vld [vmem:[%s871_s1 + $0x20] sm:$0xff] }
   0x4   :  { %647 = vmatprep.subr.bf16.mxu0 %v646_v3 }
   0x5   :  { %11 = vsyncpa [#allocation3], 0  ;;  %v29_v11 = vsub.s32 0, %v28_v7  ;;  %v40_v12 = vsub.s32 1, %v28_v7  ;;  %649 = vmatpush3.bf16.msra.mxu0 %v646_v3  ;;  %v170_v13 = vld [vmem:[%s872_s2] sm:$0xff]  ;;  %v171_v14 = vld [vmem:[%s872_s2 + $0x8] sm:$0xff]  ;;  %v654_v18 = vpack.c.bf16 %v66_v10, %v65_v9 }
   0x6   :  { %651 = vmatprep.subr.bf16.mxu0 %v650_v8  ;;  %v172_v15 = vld [vmem:[%s872_s2 + $0x10] sm:$0xff]  ;;  %v658_v19 = vpack.c.bf16 %v171_v14, %v170_v13  ;;  %v173_v20 = vld [vmem:[%s872_s2 + $0x18] sm:$0xff]  ;;  %vm81_vm0 = vcmask 1041408   ;;  %v26_v23 = vand.u32 127, %v25_v0  ;;  %vm68_vm1 = vcmask 408576   ;;  %s708_s2 = smov 112  }
   0x7   :  { %v30_v16 = vrot.slane %v24_v6, %v29_v11  ;;  %v41_v17 = vrot.slane %v24_v6, %v40_v12  ;;  %v662_v21 = vpack.c.bf16 %v173_v20, %v172_v15  ;;  %v67_v22 = vld [vmem:[%s871_s1 + $0x30] sm:$0x3]  ;;  %v706_v26 = vmov 0.0   ;;  %s707_s1 = smov 120   ;;  %s709_s20 = smov 104  }
   0x8   :  { %659 = vmatprep.subr.bf16.mxu1 %v658_v19  ;;  %vm174_vm6 = vcmask 261120   ;;  %vm276_vm7 = vcmask 1046528   ;;  %vm299_vm8 = vcmask 1045504   ;;  %vm342_vm9 = vcmask 1044480   ;;  %s710_s21 = smov 96  }
   0x9   :  { %32 = vbcast.lane.b32.xlu0 %v30_v16, 256  ;;  %43 = vbcast.lane.b32.xlu1 %v41_v17, 256  ;;  %vm385_vm10 = vcmask 1043456   ;;  %vm324_vm11 = vcmask 62464   ;;  %vm322_vm12 = vcmask 64512   ;;  %vm367_vm13 = vcmask 258240  }
   0xa   :  { %653 = vmatpush3.bf16.msra.mxu0 %v650_v8  ;;  %661 = vmatpush3.bf16.msra.mxu1 %v658_v19  ;;  %vm365_vm14 = vcmask 261312   ;;  %vm410_vm15 = vcmask 519616  }
   0xb   :  { %655 = vmatprep.subr.bf16.mxu0 %v654_v18  ;;  %663 = vmatprep.subr.bf16.mxu1 %v662_v21 }
   0xd   :  { %36 = vbcast.lane.b32.xlu0 %v30_v16, 264  ;;  %47 = vbcast.lane.b32.xlu1 %v41_v17, 264 }
   0xe   :  { %657 = vmatpush3.bf16.msra.mxu0 %v654_v18  ;;  %665 = vmatpush3.bf16.msra.mxu1 %v662_v21 }
   0xf   :  { %615 = vmatprep.subr.msk.mxu0 %vm81_vm0, %v67_v22 }
  0x12   :  { %616 = vmatpush3.msk.msra.mxu0 %vm81_vm0, %v67_v22  ;;  %vm408_vm0 = vcmask 523712  }
  0x7b   :  { %v33_v24 = vpop.permute.xlu0 %32  ;;  %v44_v25 = vpop.permute.xlu1 %43 }
  0x7c   :  { %vm49_vm2 = vcmp.eq.s32.totalorder %v33_v24, %v26_v23  ;;  %vm51_vm3 = vcmp.eq.s32.totalorder %v44_v25, %v26_v23 }
  0x7d   :  { %v563_v27 = vsel %vm49_vm2, 1.0, %v706_v26  ;;  %v565_v30 = vsel %vm51_vm3, 1.0, %v706_v26  ;;  %vm712_vm2 = vmmov 0   ;;  %vm446_vm3 = vcmask 130048  }
  0x7e   :  { %617 = vmatprep.mubr.msk.f32.mxu0 %vm68_vm1, %v563_v27 }
  0x7f   :  { %v37_v28 = vpop.permute.xlu0 %36  ;;  %v48_v29 = vpop.permute.xlu1 %47 }
  0x80   :  { %vm50_vm4 = vcmp.eq.s32.totalorder %v37_v28, %v26_v23  ;;  %vm52_vm5 = vcmp.eq.s32.totalorder %v48_v29, %v26_v23 }
  0x81   :  { %v564_v31 = vsel %vm50_vm4, 1.0, %v706_v26  ;;  %v566_v32 = vsel %vm52_vm5, 1.0, %v706_v26  ;;  %vm467_vm4 = vcmask 195584   ;;  %vm547_vm5 = vcmask 25600  }
  0x82   :  { %618 = vmatmul.mubr.msk.f32.vlgmr.msra.gmra.mrb[0].mxu0 %vm68_vm1, %v564_v31 }
  0x83   :  { %620 = vmatprep.mubr.msk.f32.mxu0 %vm68_vm1, %v565_v30 }
  0x86   :  { %621 = vmatmul.mubr.msk.f32.gmra.mrb[2].mxu0 %vm68_vm1, %v566_v32  ;;  %vm430_vm1 = vcmask 1041409  }
 0x155   :  { %v619_v33 = vpop.f32.mrb[0].mxu0 }
 0x156   :  { %v151_v34 = vpop.f32.mrb[1].mxu0 }
 0x157   :  { %631 = vmatprep.mubr.msk.f32.mxu1 %vm174_vm6, %v151_v34 }
 0x158   :  { %632 = vmatmul.mubr.msk.f32.vlgmr.msra.gmra.mrb[0].mxu1 %vm174_vm6, %v619_v33 }
 0x159   :  { %v622_v35 = vpop.f32.mrb[2].mxu0 }
 0x15a   :  { %v161_v36 = vpop.f32.mrb[3].mxu0 }
 0x15b   :  { %634 = vmatprep.mubr.msk.f32.mxu1 %vm174_vm6, %v161_v36 }
 0x15c   :  { %635 = vmatmul.mubr.msk.f32.gmra.mrb[2].mxu1 %vm174_vm6, %v622_v35 }
 0x15d   :  { %643 = vmatprep.mubr.msk.f32.mxu1 %vm712_vm2, %v706_v26 }
 0x22b   :  { %v633_v37 = vpop.f32.mrb[0].mxu1 }
 0x22c   :  { %v253_v38 = vpop.f32.mrb[1].mxu1  ;;  %v278_v39 = vrot.slane %v633_v37, 1  ;;  %v301_v40 = vrot.slane %v633_v37, 2  ;;  %v344_v41 = vrot.slane %v633_v37, 3  ;;  %v387_v42 = vrot.slane %v633_v37, 4 }
 0x22d   :  { %v277_v43 = vrot.slane %v253_v38, 1  ;;  %v300_v44 = vrot.slane %v253_v38, 2  ;;  %v343_v45 = vrot.slane %v253_v38, 3  ;;  %v386_v46 = vrot.slane %v253_v38, 4 }
 0x22e   :  { %285 = vrot.lane.b32.xlu1 %v278_v39, %s707_s1 }
 0x22f   :  { %v279_v47 = vsel %vm276_vm7, %v277_v43, %v278_v39  ;;  %v302_v48 = vsel %vm299_vm8, %v300_v44, %v301_v40  ;;  %v345_v49 = vsel %vm342_vm9, %v343_v45, %v344_v41  ;;  %v798_v50 = vpop.f32.mrb[2].mxu1  ;;  %v388_v51 = vsel %vm385_vm10, %v386_v46, %v387_v42 }
 0x230   :  { %283 = vrot.lane.b32.xlu0 %v279_v47, %s707_s1  ;;  %v802_v52 = vpop.f32.mrb[3].mxu1  ;;  %v281_v53 = vrot.slane %v798_v50, 1  ;;  %v304_v54 = vrot.slane %v798_v50, 2  ;;  %v347_v55 = vrot.slane %v798_v50, 3  ;;  %v390_v56 = vrot.slane %v798_v50, 4 }
 0x231   :  { %v280_v57 = vrot.slane %v802_v52, 1  ;;  %v303_v58 = vrot.slane %v802_v52, 2  ;;  %v346_v59 = vrot.slane %v802_v52, 3  ;;  %v389_v60 = vrot.slane %v802_v52, 4 }
 0x232   :  { %308 = vrot.lane.b32.xlu1 %v301_v40, %s708_s2 }
 0x233   :  { %v282_v61 = vsel %vm276_vm7, %v280_v57, %v281_v53  ;;  %v305_v62 = vsel %vm299_vm8, %v303_v58, %v304_v54  ;;  %v348_v63 = vsel %vm342_vm9, %v346_v59, %v347_v55  ;;  %v391_v0 = vsel %vm385_vm10, %v389_v60, %v390_v56 }
 0x234   :  { %306 = vrot.lane.b32.xlu0 %v302_v48, %s708_s2 }
 0x236   :  { %351 = vrot.lane.b32.xlu1 %v344_v41, %s709_s20 }
 0x238   :  { %349 = vrot.lane.b32.xlu0 %v345_v49, %s709_s20 }
 0x23a   :  { %394 = vrot.lane.b32.xlu1 %v387_v42, %s710_s21 }
 0x23c   :  { %392 = vrot.lane.b32.xlu0 %v388_v51, %s710_s21 }
 0x23e   :  { %289 = vrot.lane.b32.xlu1 %v281_v53, %s707_s1 }
 0x240   :  { %287 = vrot.lane.b32.xlu0 %v282_v61, %s707_s1 }
 0x242   :  { %312 = vrot.lane.b32.xlu1 %v304_v54, %s708_s2 }
 0x244   :  { %310 = vrot.lane.b32.xlu0 %v305_v62, %s708_s2 }
 0x246   :  { %355 = vrot.lane.b32.xlu1 %v347_v55, %s709_s20 }
 0x248   :  { %353 = vrot.lane.b32.xlu0 %v348_v63, %s709_s20  ;;  %v457_v63 = vld [vmem:[%s874_s4] sm:$0xff] }
 0x24a   :  { %398 = vrot.lane.b32.xlu1 %v390_v56, %s710_s21 }
 0x24c   :  { %396 = vrot.lane.b32.xlu0 %v391_v0, %s710_s21  ;;  %v458_v0 = vld [vmem:[%s874_s4 + $0x8] sm:$0xff] }
 0x2a0   :  { %v286_v1 = vpop.permute.xlu1 %285 }
 0x2a1   :  { %v296_v3 = vadd.f32 %v633_v37, %v286_v1 }
 0x2a2   :  { %v284_v2 = vpop.permute.xlu0 %283 }
 0x2a3   :  { %v295_v5 = vadd.f32 %v284_v2, %v253_v38 }
 0x2a4   :  { %v309_v4 = vpop.permute.xlu1 %308 }
 0x2a5   :  { %v319_v6 = vadd.f32 %v309_v4, %v296_v3  ;;  %v711_v4 = vmov 0.0|0.0  }
 0x2a6   :  { %v307_v7 = vpop.permute.xlu0 %306  ;;  %666 = vmatprep.subr.bf16.mxu1 %v711_v4 }
 0x2a7   :  { %v318_v8 = vadd.f32 %v307_v7, %v295_v5  ;;  %v325_v10 = vsel %vm324_vm11, %v319_v6, -inf  ;;  %v667_v5 = vpack.c.bf16 %v458_v0, %v457_v63 }
 0x2a8   :  { %v352_v9 = vpop.permute.xlu1 %351 }
 0x2a9   :  { %v323_v11 = vsel %vm322_vm12, %v318_v8, -inf  ;;  %v362_v12 = vadd.f32 %v352_v9, %v319_v6  ;;  %668 = vmatpush3.bf16.msra.mxu1 %v667_v5 }
 0x2aa   :  { %v326_v13 = vmax.f32 %v323_v11, %v325_v10  ;;  %v350_v14 = vpop.permute.xlu0 %349  ;;  %641 = vmatprep.subr.mxu1 %v706_v26  ;;  %v576_v26 = vld [vmem:[%s873_s3] ss:$0 sm:$0xff]  ;;  %s714_s3 = smov [#allocation2]  }
 0x2ab   :  { %v361_v15 = vadd.f32 %v350_v14, %v318_v8  ;;  %v368_v17 = vsel %vm367_vm13, %v362_v12, -inf  ;;  %s555_s8 = sshll.u32 %s714_s3, 4  ;;  %s556_s8 = int_to_ptr.vmem [resolvable:$true] %s555_s8 }
 0x2ac   :  { %v395_v16 = vpop.permute.xlu1 %394  ;;  %v327_v23 = vrot.slane %v326_v13, 4  ;;  %s682_s9 = scalar_lea.vmem %s556_s8, 32  ;;  %p687_p1 = scmp.lt.s32.totalorder %s556_s8, %s556_s8 }
 0x2ad   :  { %v366_v18 = vsel %vm365_vm14, %v361_v15, -inf  ;;  %v405_v19 = vadd.f32 %v395_v16, %v362_v12  ;;  %p683_p0 = scmp.ne.s32.totalorder %s556_s8, %s682_s9  ;;  %p688_p2 = scmp.lt.s32.totalorder %s682_s9, %s682_s9 }
 0x2ae   :  { %v369_v20 = vmax.f32 %v366_v18, %v368_v17  ;;  %v393_v21 = vpop.permute.xlu0 %392  ;;  %v328_v31 = vmax.f32 %v326_v13, %v327_v23 }
 0x2af   :  { %v404_v22 = vadd.f32 %v393_v21, %v361_v15  ;;  %v411_v25 = vsel %vm410_vm15, %v405_v19, -inf  ;;  %v459_v19 = vld [vmem:[%s874_s4 + $0x10] sm:$0xff]  ;;  %s713_s4 = smov 88   ;;  %p689_p3 = por %p688_p2, %p687_p1 }
 0x2b0   :  { %v290_v24 = vpop.permute.xlu1 %289  ;;  %v370_v33 = vrot.slane %v369_v20, 4  ;;  %v329_v38 = vrot.slane %v328_v31, 2  ;;  %642 = vmatpush3.msra.mxu1 %v459_v19 }
 0x2b1   :  { %v409_v27 = vsel %vm408_vm0, %v404_v22, -inf  ;;  %v298_v30 = vadd.f32 %v798_v50, %v290_v24  ;;  %p690_p4 = pnand %p689_p3, %p683_p0 }
 0x2b2   :  { %v412_v28 = vmax.f32 %v409_v27, %v411_v25  ;;  %v288_v29 = vpop.permute.xlu0 %287  ;;  %v371_v40 = vmax.f32 %v369_v20, %v370_v33  ;;  %v330_v48 = vmax.f32 %v328_v31, %v329_v38 }
 0x2b3   :  { %v297_v34 = vadd.f32 %v288_v29, %v802_v52 }
 0x2b4   :  { %v313_v32 = vpop.permute.xlu1 %312  ;;  %v413_v44 = vrot.slane %v412_v28, 4  ;;  %v372_v51 = vrot.slane %v371_v40, 2  ;;  %v331_v60 = vrot.slane %v330_v48, 1 }
 0x2b5   :  { %v321_v35 = vadd.f32 %v313_v32, %v298_v30 }
 0x2b6   :  { %v311_v36 = vpop.permute.xlu0 %310  ;;  %v414_v55 = vmax.f32 %v412_v28, %v413_v44  ;;  %v373_v1 = vmax.f32 %v371_v40, %v372_v51  ;;  %v332_v14 = vmax.f32 %v330_v48, %v331_v60 }
 0x2b7   :  { %v320_v37 = vadd.f32 %v311_v36, %v297_v34  ;;  %v334_v41 = vsel %vm324_vm11, %v321_v35, -inf }
 0x2b8   :  { %v356_v39 = vpop.permute.xlu1 %355  ;;  %v415_v6 = vrot.slane %v414_v55, 2  ;;  %v374_v13 = vrot.slane %v373_v1, 1 }
 0x2b9   :  { %v333_v42 = vsel %vm322_vm12, %v320_v37, -inf  ;;  %v364_v43 = vadd.f32 %v356_v39, %v321_v35  ;;  %v577_v39 = vld [vmem:[%s875_s5] ss:$0 sm:$0xff] }
 0x2ba   :  { %v335_v45 = vmax.f32 %v333_v42, %v334_v41  ;;  %v354_v46 = vpop.permute.xlu0 %353  ;;  %v416_v15 = vmax.f32 %v414_v55, %v415_v6  ;;  %v375_v24 = vmax.f32 %v373_v1, %v374_v13 }
 0x2bb   :  { %v363_v47 = vadd.f32 %v354_v46, %v320_v37  ;;  %v377_v52 = vsel %vm367_vm13, %v364_v43, -inf }
 0x2bc   :  { %v336_v49 = vrot.slane %v335_v45, 4  ;;  %v399_v50 = vpop.permute.xlu1 %398  ;;  %v417_v27 = vrot.slane %v416_v15, 1 }
 0x2bd   :  { %v376_v53 = vsel %vm365_vm14, %v363_v47, -inf  ;;  %v407_v54 = vadd.f32 %v399_v50, %v364_v43 }
 0x2be   :  { %v337_v56 = vmax.f32 %v335_v45, %v336_v49  ;;  %v378_v57 = vmax.f32 %v376_v53, %v377_v52  ;;  %v397_v58 = vpop.permute.xlu0 %396  ;;  %v418_v30 = vmax.f32 %v416_v15, %v417_v27 }
 0x2bf   :  { %v406_v59 = vadd.f32 %v397_v58, %v363_v47  ;;  %v420_v2 = vsel %vm410_vm15, %v407_v54, -inf }
 0x2c0   :  { %v338_v61 = vrot.slane %v337_v56, 2  ;;  %v379_v62 = vrot.slane %v378_v57, 4 }
 0x2c1   :  { %v419_v3 = vsel %vm408_vm0, %v406_v59, -inf }
 0x2c2   :  { %v339_v7 = vmax.f32 %v337_v56, %v338_v61  ;;  %v380_v8 = vmax.f32 %v378_v57, %v379_v62  ;;  %v421_v9 = vmax.f32 %v419_v3, %v420_v2 }
 0x2c4   :  { %v340_v10 = vrot.slane %v339_v7, 1  ;;  %v381_v11 = vrot.slane %v380_v8, 2  ;;  %v422_v12 = vrot.slane %v421_v9, 4 }
 0x2c6   :  { %v382_v16 = vmax.f32 %v380_v8, %v381_v11  ;;  %v423_v17 = vmax.f32 %v421_v9, %v422_v12  ;;  %v341_v18 = vmax.f32 %v339_v7, %v340_v10 }
 0x2c8   :  { %v424_v20 = vrot.slane %v423_v17, 2  ;;  %v383_v21 = vrot.slane %v382_v16, 1  ;;  %v431_v22 = vsel %vm430_vm1, %v341_v18, %v332_v14 }
 0x2ca   :  { %v425_v23 = vmax.f32 %v423_v17, %v424_v20  ;;  %v384_v25 = vmax.f32 %v382_v16, %v383_v21 }
 0x2cc   :  { %v435_v28 = vsel %vm430_vm1, %v384_v25, %v375_v24  ;;  %v426_v29 = vrot.slane %v425_v23, 1 }
 0x2cd   :  { %436 = vrot.lane.b32.xlu0 %v435_v28, %s708_s2 }
 0x2ce   :  { %v427_v31 = vmax.f32 %v425_v23, %v426_v29 }
 0x2d0   :  { %v441_v32 = vsel %vm430_vm1, %v427_v31, %v418_v30 }
 0x2d1   :  { %442 = vrot.lane.b32.xlu1 %v441_v32, %s713_s4 }
 0x33f   :  { %v437_v33 = vpop.permute.xlu0 %436 }
 0x340   :  { %v445_v34 = vsel %vm322_vm12, %v431_v22, %v437_v33 }
 0x343   :  { %v443_v35 = vpop.permute.xlu1 %442 }
 0x344   :  { %v447_v36 = vsel %vm446_vm3, %v445_v34, %v443_v35 }
 0x345   :  { %v455_v37 = vadd.f32 %v576_v26, %v447_v36 }
 0x347   :  { %v456_v38 = vmax.f32 %v455_v37, 0.0 }
 0x349   :  { %644 = vmatmul.mubr.msk.f32.vlgmr.msra.gmra.mrb[4].mxu1 %vm467_vm4, %v456_v38 }
 0x41c   :  { %v537_v40 = vpop.f32.mrb[4].mxu1 }
 0x41d   :  { %v538_v41 = vadd.f32 %v577_v39, %v537_v40  ;;  %v645_v42 = vpop.f32.mrb[5].mxu1 }
 0x41f   :  { %v579_v43 = vmul.f32 -1.442695, %v538_v41 }
 0x421   :  { %678 = vpow2.f32 %v579_v43 }
 0x42b   :  { %v679_v44 = vpop.eup %678 }
 0x42c   :  { %v544_v45 = vadd.f32 1.0, %v679_v44 }
 0x42e   :  { %680 = vrcp.f32 %v544_v45 }
 0x438   :  { %v681_v46 = vpop.eup %680 }
 0x439   :  { %548 = vst.msk [vmem:[#allocation2] sm:$0x3] %vm547_vm5, %v681_v46 }
 0x43a   :  { %693 = shalt.err (!%p690_p4)
}
 0x43b   :  { %s694_s11 = scalar_lea.hbm %s876_s6, 32 }
 0x43c   :  { %p695_p5 = scmp.ne.s32.totalorder %s876_s6, %s694_s11  ;;  %p698_p6 = scmp.lt.u32.totalorder %s694_s11, %s876_s6 }
 0x43e   :  { %p700_p7 = pnand %p698_p6, %p695_p5 }
 0x440   :  { %703 = shalt.err (!%p700_p7)
}
 0x441   :  { %558 = dma.vmem_to_hbm [thread:$0]  %s556_s8, 32, %s876_s6, [#allocation3]  }
 0x442   :  { %704 = dma.done.wait [#allocation3], 32  }
 0x443   :  { %705 = vsyncadd [#allocation3], 4294967264 }
 0x444   :  { %562 = vsyncpa [#allocation3], 1 }

</bundles_post_ra>
